<compile_context>
chip_gen: v7x
topology: tpu7x:2x2x1
jax: 0.10.0
libtpu: 0.0.40
codegen_flags: <defaults>
</compile_context>

<pallas_src>
import jax
import jax.numpy as jnp
from jax.experimental import pallas as pl
from jax.experimental.pallas import tpu as pltpu


# ---------------------------------------------------------------------------
# Kernels
# ---------------------------------------------------------------------------

def _sr_kernel_narrow(x1_ref, x2_ref, wpay_ref, whdr_ref, wfc_ref, bias_ref,
                      o_ref):
    """Second layer as two 128-wide dots (ideal for the 128x128 MXUs of v5e)."""
    b_pay = bias_ref[0:1, 0:128]
    b_hdr = bias_ref[1:2, 0:128]
    b_fc = bias_ref[2:3, 0:128]
    wdt = wfc_ref.dtype

    # Branch 1/2: relu(fc_pay(x1)) / relu(fc_hdr(x2)); bias + relu in f32.
    h1 = jnp.maximum(
        jnp.dot(x1_ref[...], wpay_ref[...],
                preferred_element_type=jnp.float32) + b_pay, 0.0)
    h2 = jnp.maximum(
        jnp.dot(x2_ref[...], whdr_ref[...],
                preferred_element_type=jnp.float32) + b_hdr, 0.0)

    # drop(0.2) -> identity at inference.
    # Second layer: write each branch straight into its lane-half of the
    # lane-dense [TILE_B, 256] output (no sublane concat / split copies).
    y1 = jnp.dot(h1.astype(wdt), wfc_ref[...],
                 preferred_element_type=jnp.float32) + b_fc
    y2 = jnp.dot(h2.astype(wdt), wfc_ref[...],
                 preferred_element_type=jnp.float32) + b_fc
    o_ref[:, 0:128] = jnp.maximum(y1, 0.0).astype(o_ref.dtype)
    o_ref[:, 128:256] = jnp.maximum(y2, 0.0).astype(o_ref.dtype)


def _sr_kernel_wide(x1_ref, x2_ref, wpay_ref, whdr_ref, wfc2_ref, bias_ref,
                    o_ref):
    """Second layer as one 256x256 block-diagonal dot (fills v6e/v7x MXU),
    single unmasked 256-lane output store."""
    b_pay = bias_ref[0:1, 0:128]
    b_hdr = bias_ref[1:2, 0:128]
    b_fc2 = bias_ref[2:3, :]          # [b_fc | b_fc], 256 lanes
    wdt = wfc2_ref.dtype

    h1 = jnp.maximum(
        jnp.dot(x1_ref[...], wpay_ref[...],
                preferred_element_type=jnp.float32) + b_pay, 0.0)
    h2 = jnp.maximum(
        jnp.dot(x2_ref[...], whdr_ref[...],
                preferred_element_type=jnp.float32) + b_hdr, 0.0)

    # drop(0.2) -> identity at inference.
    h = jnp.concatenate([h1, h2], axis=1).astype(wdt)   # (TILE_B, 256) lane-dense
    y = jnp.dot(h, wfc2_ref[...],
                preferred_element_type=jnp.float32) + b_fc2
    o_ref[...] = jnp.maximum(y, 0.0).astype(o_ref.dtype)


# ---------------------------------------------------------------------------
# Host-side helpers
# ---------------------------------------------------------------------------

_ROW_ALIGN = 16  # multiple of the bf16 sublane pack (also a multiple of 8)


def _round_up(n, m):
    return ((n + m - 1) // m) * m


def _pick_tile(B, tile_b):
    """Batch-tile size that is sublane aligned, avoids a mostly-padded last
    tile, and (when B is large enough) yields >= 2 grid steps so v7x can shard
    the 'parallel' batch axis across both TensorCores."""
    max_tb = max(_ROW_ALIGN, _round_up(min(tile_b, B), _ROW_ALIGN))
    n_tiles = pl.cdiv(B, max_tb)
    if n_tiles == 1 and B > _ROW_ALIGN:
        n_tiles = 2
    tb = _round_up(pl.cdiv(B, n_tiles), _ROW_ALIGN)
    return min(tb, max_tb)


def _has_wide_mxu():
    """True on chips with a 256-wide MXU (v6e / v7x); False -> 128x128 (v5e)."""
    try:
        kind = jax.devices()[0].device_kind.lower()
    except Exception:  # pragma: no cover - conservative fallback
        return False
    return any(tag in kind for tag in ("v6", "v7", "7x"))


def sr_forward(x1, x2, params, *, tile_b=2048, compute_dtype=jnp.float32,
               out_dtype=None, wide_mxu=None):
    """x1: [B, 76], x2: [B, 64] -> output [B, 2, 128] (out_dtype)."""
    B = x1.shape[0]
    wpay, whdr, wfc, bias = params
    if out_dtype is None:
        out_dtype = compute_dtype
    if wide_mxu is None:
        wide_mxu = _has_wide_mxu()

    cdt = compute_dtype
    x1 = x1.astype(cdt)
    x2 = x2.astype(cdt)
    wpay = wpay.astype(cdt)
    whdr = whdr.astype(cdt)

    if wide_mxu:
        # Block-diagonal (256,256) second-layer weight: zero blocks cost
        # nothing on a 256-wide MXU and collapse the output to one store.
        wfc2 = jnp.zeros((256, 256), cdt)
        wfc2 = wfc2.at[0:128, 0:128].set(wfc.astype(cdt))
        wfc2 = wfc2.at[128:256, 128:256].set(wfc.astype(cdt))
        kernel = _sr_kernel_wide
        wfc_arg = wfc2
        wfc_spec = pl.BlockSpec((256, 256), lambda i: (0, 0))
    else:
        kernel = _sr_kernel_narrow
        wfc_arg = wfc.astype(cdt)
        wfc_spec = pl.BlockSpec((128, 128), lambda i: (0, 0))

    tb = _pick_tile(B, tile_b)
    b_pad = _round_up(B, tb)
    if b_pad != B:
        pad = b_pad - B
        x1 = jnp.pad(x1, ((0, pad), (0, 0)))
        x2 = jnp.pad(x2, ((0, pad), (0, 0)))
    grid = (b_pad // tb,)

    out = pl.pallas_call(
        kernel,
        out_shape=jax.ShapeDtypeStruct((b_pad, 256), out_dtype),
        grid=grid,
        in_specs=[
            pl.BlockSpec((tb, 76), lambda i: (i, 0)),      # x1 tile (streamed)
            pl.BlockSpec((tb, 64), lambda i: (i, 0)),      # x2 tile (streamed)
            pl.BlockSpec((76, 128), lambda i: (0, 0)),     # wpay  (VMEM resident)
            pl.BlockSpec((64, 128), lambda i: (0, 0)),     # whdr  (VMEM resident)
            wfc_spec,                                      # wfc / wfc2 (resident)
            pl.BlockSpec((8, 256), lambda i: (0, 0)),      # packed biases (f32, resident)
        ],
        out_specs=pl.BlockSpec((tb, 256), lambda i: (i, 0)),
        compiler_params=pltpu.CompilerParams(
            dimension_semantics=("parallel",)),
    )(x1, x2, wpay, whdr, wfc_arg, bias)

    # Free reshape of the lane-dense [B, 256] buffer to the [B, 2, 128] API.
    return out[:B].reshape(B, 2, 128)


def init_params(key):
    """Deterministic synthetic parameters with the shapes from SR.__init__."""
    k = jax.random.split(key, 6)
    # PyTorch Linear stores [out, in]; we keep [in, out] for the kernel.
    wpay = jax.random.normal(k[0], (76, 128), jnp.float32) * 0.05
    bpay = jax.random.normal(k[1], (128,), jnp.float32) * 0.05
    whdr = jax.random.normal(k[2], (64, 128), jnp.float32) * 0.05
    bhdr = jax.random.normal(k[3], (128,), jnp.float32) * 0.05
    wfc = jax.random.normal(k[4], (128, 128), jnp.float32) * 0.05
    bfc = jax.random.normal(k[5], (128,), jnp.float32) * 0.05
    # Pack the three biases into one (8, 256) f32 tile:
    #   row0 lanes 0:128 = b_pay, row1 lanes 0:128 = b_hdr, row2 = [b_fc | b_fc].
    bias = jnp.zeros((8, 256), jnp.float32)
    bias = bias.at[0, 0:128].set(bpay)
    bias = bias.at[1, 0:128].set(bhdr)
    bias = bias.at[2, 0:128].set(bfc)
    bias = bias.at[2, 128:256].set(bfc)
    return (wpay, whdr, wfc, bias)


if __name__ == "__main__":
    key = jax.random.PRNGKey(0)
    kp, kx1, kx2 = jax.random.split(key, 3)

    B = 12  # deliberately not sublane-aligned -> exercises batch padding
    x1 = jax.random.normal(kx1, (B, 76), jnp.float32)   # "payload" features
    x2 = jax.random.normal(kx2, (B, 64), jnp.float32)   # "header" features
    params = init_params(kp)

    # Pure-JAX reference (same math, no Pallas).
    wpay, whdr, wfc, bias = params
    b_pay, b_hdr, b_fc = bias[0:1, 0:128], bias[1:2, 0:128], bias[2:3, 0:128]
    h1 = jnp.maximum(x1 @ wpay + b_pay, 0.0)
    h2 = jnp.maximum(x2 @ whdr + b_hdr, 0.0)
    ref = jnp.stack([jnp.maximum(h1 @ wfc + b_fc, 0.0),
                     jnp.maximum(h2 @ wfc + b_fc, 0.0)], axis=1)

    # f32 path (wide/narrow second layer auto-selected from the device MXU;
    # both variants are numerically identical).
    out = sr_forward(x1, x2, params)
    jax.block_until_ready(out)
    assert out.shape == (B, 2, 128)
    assert jnp.allclose(out, ref, atol=1e-5, rtol=1e-5)

    # bf16 I/O path (halves HBM traffic at large B); looser tolerance.
    out_bf16 = sr_forward(x1, x2, params, compute_dtype=jnp.bfloat16,
                          out_dtype=jnp.bfloat16)
    jax.block_until_ready(out_bf16)
    assert out_bf16.shape == (B, 2, 128)
    assert out_bf16.dtype == jnp.bfloat16
    assert jnp.allclose(out_bf16.astype(jnp.float32), ref, atol=3e-2, rtol=3e-2)

    print("KERNEL_OK")
</pallas_src>

<mosaic_0001>
module attributes {stable_mosaic.version = 11 : i64} {
  func.func @_sr_kernel_narrow(%arg0: i32, %arg1: memref<16x76xf32, #tpu.memory_space<vmem>>, %arg2: memref<16x64xf32, #tpu.memory_space<vmem>>, %arg3: memref<76x128xf32, #tpu.memory_space<vmem>>, %arg4: memref<64x128xf32, #tpu.memory_space<vmem>>, %arg5: memref<128x128xf32, #tpu.memory_space<vmem>>, %arg6: memref<8x256xf32, #tpu.memory_space<vmem>>, %arg7: memref<16x256xf32, #tpu.memory_space<vmem>>) attributes {dimension_semantics = [#tpu.dimension_semantics<parallel>], iteration_bounds = array<i64: 1>, scalar_prefetch = 0 : i64, scratch_operands = 0 : i64, tpu.core_type = #tpu.core_type<tc>, window_params = [{transform_indices = @transform_0, window_bounds = array<i64: 16, 76>}, {transform_indices = @transform_1, window_bounds = array<i64: 16, 64>}, {pipeline_mode = #tpu.pipeline_mode<synchronous>, transform_indices = @transform_2, window_bounds = array<i64: 76, 128>}, {pipeline_mode = #tpu.pipeline_mode<synchronous>, transform_indices = @transform_3, window_bounds = array<i64: 64, 128>}, {pipeline_mode = #tpu.pipeline_mode<synchronous>, transform_indices = @transform_4, window_bounds = array<i64: 128, 128>}, {pipeline_mode = #tpu.pipeline_mode<synchronous>, transform_indices = @transform_5, window_bounds = array<i64: 8, 256>}, {transform_indices = @transform_6, window_bounds = array<i64: 16, 256>}]} {
    %c0 = arith.constant 0 : index
    %c0_0 = arith.constant 0 : index
    %0 = vector.load %arg6[%c0, %c0_0] : memref<8x256xf32, #tpu.memory_space<vmem>>, vector<1x128xf32>
    %c1 = arith.constant 1 : index
    %c0_1 = arith.constant 0 : index
    %1 = vector.load %arg6[%c1, %c0_1] : memref<8x256xf32, #tpu.memory_space<vmem>>, vector<1x128xf32>
    %c2 = arith.constant 2 : index
    %c0_2 = arith.constant 0 : index
    %2 = vector.load %arg6[%c2, %c0_2] : memref<8x256xf32, #tpu.memory_space<vmem>>, vector<1x128xf32>
    %c0_3 = arith.constant 0 : index
    %c0_4 = arith.constant 0 : index
    %3 = vector.load %arg1[%c0_3, %c0_4] : memref<16x76xf32, #tpu.memory_space<vmem>>, vector<16x76xf32>
    %c0_5 = arith.constant 0 : index
    %c0_6 = arith.constant 0 : index
    %4 = vector.load %arg3[%c0_5, %c0_6] : memref<76x128xf32, #tpu.memory_space<vmem>>, vector<76x128xf32>
    %cst = arith.constant dense<0.000000e+00> : vector<16x128xf32>
    %5 = tpu.matmul %3, %4, %cst {dimension_numbers = #tpu.dot_dimension_numbers<[1], [0], [0], [1], [0, 0, 1, 1], [], []>} : vector<16x76xf32>, vector<76x128xf32>, vector<16x128xf32> -> vector<16x128xf32>
    %6 = vector.broadcast %0 : vector<1x128xf32> to vector<16x128xf32>
    %7 = arith.addf %5, %6 : vector<16x128xf32>
    %cst_7 = arith.constant 0.000000e+00 : f32
    %8 = vector.broadcast %cst_7 : f32 to vector<16x128xf32>
    %9 = arith.maximumf %7, %8 : vector<16x128xf32>
    %c0_8 = arith.constant 0 : index
    %c0_9 = arith.constant 0 : index
    %10 = vector.load %arg2[%c0_8, %c0_9] : memref<16x64xf32, #tpu.memory_space<vmem>>, vector<16x64xf32>
    %c0_10 = arith.constant 0 : index
    %c0_11 = arith.constant 0 : index
    %11 = vector.load %arg4[%c0_10, %c0_11] : memref<64x128xf32, #tpu.memory_space<vmem>>, vector<64x128xf32>
    %cst_12 = arith.constant dense<0.000000e+00> : vector<16x128xf32>
    %12 = tpu.matmul %10, %11, %cst_12 {dimension_numbers = #tpu.dot_dimension_numbers<[1], [0], [0], [1], [0, 0, 1, 1], [], []>} : vector<16x64xf32>, vector<64x128xf32>, vector<16x128xf32> -> vector<16x128xf32>
    %13 = vector.broadcast %1 : vector<1x128xf32> to vector<16x128xf32>
    %14 = arith.addf %12, %13 : vector<16x128xf32>
    %cst_13 = arith.constant 0.000000e+00 : f32
    %15 = vector.broadcast %cst_13 : f32 to vector<16x128xf32>
    %16 = arith.maximumf %14, %15 : vector<16x128xf32>
    %c0_14 = arith.constant 0 : index
    %c0_15 = arith.constant 0 : index
    %17 = vector.load %arg5[%c0_14, %c0_15] : memref<128x128xf32, #tpu.memory_space<vmem>>, vector<128x128xf32>
    %cst_16 = arith.constant dense<0.000000e+00> : vector<16x128xf32>
    %18 = tpu.matmul %9, %17, %cst_16 {dimension_numbers = #tpu.dot_dimension_numbers<[1], [0], [0], [1], [0, 0, 1, 1], [], []>} : vector<16x128xf32>, vector<128x128xf32>, vector<16x128xf32> -> vector<16x128xf32>
    %19 = vector.broadcast %2 : vector<1x128xf32> to vector<16x128xf32>
    %20 = arith.addf %18, %19 : vector<16x128xf32>
    %c0_17 = arith.constant 0 : index
    %c0_18 = arith.constant 0 : index
    %21 = vector.load %arg5[%c0_17, %c0_18] : memref<128x128xf32, #tpu.memory_space<vmem>>, vector<128x128xf32>
    %cst_19 = arith.constant dense<0.000000e+00> : vector<16x128xf32>
    %22 = tpu.matmul %16, %21, %cst_19 {dimension_numbers = #tpu.dot_dimension_numbers<[1], [0], [0], [1], [0, 0, 1, 1], [], []>} : vector<16x128xf32>, vector<128x128xf32>, vector<16x128xf32> -> vector<16x128xf32>
    %23 = vector.broadcast %2 : vector<1x128xf32> to vector<16x128xf32>
    %24 = arith.addf %22, %23 : vector<16x128xf32>
    %cst_20 = arith.constant 0.000000e+00 : f32
    %25 = vector.broadcast %cst_20 : f32 to vector<16x128xf32>
    %26 = arith.maximumf %20, %25 : vector<16x128xf32>
    %c0_21 = arith.constant 0 : index
    %c0_22 = arith.constant 0 : index
    %27 = vector.load %arg7[%c0_21, %c0_22] : memref<16x256xf32, #tpu.memory_space<vmem>>, vector<16x128xf32>
    tpu.vector_store %arg7[%c0_21, %c0_22], %26 {strides = array<i32>} : memref<16x256xf32, #tpu.memory_space<vmem>>, vector<16x128xf32>,
    %cst_23 = arith.constant 0.000000e+00 : f32
    %28 = vector.broadcast %cst_23 : f32 to vector<16x128xf32>
    %29 = arith.maximumf %24, %28 : vector<16x128xf32>
    %c0_24 = arith.constant 0 : index
    %c128 = arith.constant 128 : index
    %30 = vector.load %arg7[%c0_24, %c128] : memref<16x256xf32, #tpu.memory_space<vmem>>, vector<16x128xf32>
    tpu.vector_store %arg7[%c0_24, %c128], %29 {strides = array<i32>} : memref<16x256xf32, #tpu.memory_space<vmem>>, vector<16x128xf32>,
    return
  }
  func.func @transform_0(%arg0: i32) -> (i32, i32) {
    %c0_i32 = arith.constant 0 : i32
    %c0_i32_0 = arith.constant 0 : i32
    return %arg0, %c0_i32 : i32, i32
  }
  func.func @transform_1(%arg0: i32) -> (i32, i32) {
    %c0_i32 = arith.constant 0 : i32
    %c0_i32_0 = arith.constant 0 : i32
    return %arg0, %c0_i32 : i32, i32
  }
  func.func @transform_2(%arg0: i32) -> (i32, i32) {
    %c0_i32 = arith.constant 0 : i32
    %c0_i32_0 = arith.constant 0 : i32
    %c0_i32_1 = arith.constant 0 : i32
    return %c0_i32, %c0_i32_0 : i32, i32
  }
  func.func @transform_3(%arg0: i32) -> (i32, i32) {
    %c0_i32 = arith.constant 0 : i32
    %c0_i32_0 = arith.constant 0 : i32
    %c0_i32_1 = arith.constant 0 : i32
    return %c0_i32, %c0_i32_0 : i32, i32
  }
  func.func @transform_4(%arg0: i32) -> (i32, i32) {
    %c0_i32 = arith.constant 0 : i32
    %c0_i32_0 = arith.constant 0 : i32
    %c0_i32_1 = arith.constant 0 : i32
    return %c0_i32, %c0_i32_0 : i32, i32
  }
  func.func @transform_5(%arg0: i32) -> (i32, i32) {
    %c0_i32 = arith.constant 0 : i32
    %c0_i32_0 = arith.constant 0 : i32
    %c0_i32_1 = arith.constant 0 : i32
    return %c0_i32, %c0_i32_0 : i32, i32
  }
  func.func @transform_6(%arg0: i32) -> (i32, i32) {
    %c0_i32 = arith.constant 0 : i32
    %c0_i32_0 = arith.constant 0 : i32
    return %arg0, %c0_i32 : i32, i32
  }
}

</mosaic_0001>

<bundles_post_ra>
// kernel: tpu_custom_call.1
= control target key start
LH: loop header
LB: loop body
LE: loop exit
PB: predicated region body
PF: predicated region fallthrough
CT: control target
= control target key end

     0   :  { %11 = vsyncpa [#allocation3], 0  ;;  %s1070_s0 = inlined_call_operand.hbm [shape: f32[16,76], index: 0, kind: input, shape index: {}]   ;;  %s1071_s1 = inlined_call_operand.hbm [shape: f32[16,64], index: 1, kind: input, shape index: {}]   ;;  %s1072_s2 = inlined_call_operand.hbm [shape: f32[76,128], index: 2, kind: input, shape index: {}]   ;;  %s1073_s3 = inlined_call_operand.hbm [shape: f32[64,128], index: 3, kind: input, shape index: {}]   ;;  %s1074_s4 = inlined_call_operand.hbm [shape: f32[128,128], index: 4, kind: input, shape index: {}]   ;;  %s1075_s5 = inlined_call_operand.vmem [shape: f32[8,256], index: 5, kind: input, shape index: {}]   ;;  %s1076_s6 = inlined_call_operand.hbm [shape: f32[16,256], index: 6, kind: output, shape index: {}]  }
   0x1   :  { %12 = vsyncpa [#allocation6], 0 }
   0x2   :  { %13 = vsyncpa [#allocation9], 0 }
   0x3   :  { %14 = vsyncpa [#allocation4], 0  ;;  %s910_s21 = smov [#allocation5]   ;;  %s911_s23 = smov [#allocation8]  }
   0x4   :  { %s32_s22 = sshll.u32 %s910_s21, 4  ;;  %s56_s24 = sshll.u32 %s911_s23, 4  ;;  %s33_s22 = int_to_ptr.vmem [resolvable:$true] %s32_s22  ;;  %s956_s24 = int_to_ptr.vmem [resolvable:$true] %s56_s24 }
   0x5   :  { %s770_s27 = scalar_lea.hbm %s1071_s1, 256 }
   0x6   :  { %p771_p0 = scmp.ne.s32.totalorder %s1071_s1, %s770_s27  ;;  %p774_p1 = scmp.lt.u32.totalorder %s770_s27, %s1071_s1 }
   0x8   :  { %p776_p2 = pnand %p774_p1, %p771_p0 }
   0xa   :  { %779 = shalt.err (!%p776_p2)
}
   0xb   :  { %s780_s8 = scalar_lea.vmem %s33_s22, 256  ;;  %p785_p4 = scmp.lt.s32.totalorder %s33_s22, %s33_s22 }
   0xc   :  { %p781_p3 = scmp.ne.s32.totalorder %s33_s22, %s780_s8  ;;  %p786_p5 = scmp.lt.s32.totalorder %s780_s8, %s780_s8 }
   0xe   :  { %p787_p6 = por %p786_p5, %p785_p4 }
  0x10   :  { %p788_p7 = pnand %p787_p6, %p781_p3 }
  0x12   :  { %791 = shalt.err (!%p788_p7)
}
  0x13   :  { %s912_s9 = smov 128   ;;  %s913_s10 = smov 8  }
  0x14   :  { %38 = dma.hbm_to_vmem [thread:$0]  %s1071_s1, 256, %s33_s22, [#allocation6], %s912_s9, %s912_s9, %s913_s10  }
  0x15   :  { %s792_s15 = scalar_lea.hbm %s1073_s3, 1024 }
  0x16   :  { %p793_p8 = scmp.ne.s32.totalorder %s1073_s3, %s792_s15  ;;  %p796_p9 = scmp.lt.u32.totalorder %s792_s15, %s1073_s3 }
  0x18   :  { %p798_p10 = pnand %p796_p9, %p793_p8 }
  0x1a   :  { %801 = shalt.err (!%p798_p10)
}
  0x1b   :  { %s802_s20 = scalar_lea.vmem %s956_s24, 1024  ;;  %p807_p12 = scmp.lt.s32.totalorder %s956_s24, %s956_s24 }
  0x1c   :  { %p803_p11 = scmp.ne.s32.totalorder %s956_s24, %s802_s20  ;;  %p808_p13 = scmp.lt.s32.totalorder %s802_s20, %s802_s20 }
  0x1e   :  { %p809_p0 = por %p808_p13, %p807_p12 }
  0x20   :  { %p810_p1 = pnand %p809_p0, %p803_p11 }
  0x22   :  { %813 = shalt.err (!%p810_p1)
}
  0x23   :  { %62 = dma.hbm_to_vmem [thread:$0]  %s1073_s3, 1024, %s956_s24, [#allocation9], %s912_s9, %s912_s9, %s913_s10  }
  0x24   :  { %s914_s22 = smov [#allocation2]   ;;  %s915_s25 = smov [#allocation7]  }
  0x25   :  { %s20_s23 = sshll.u32 %s914_s22, 4  ;;  %s44_s26 = sshll.u32 %s915_s25, 4  ;;  %s21_s23 = int_to_ptr.vmem [resolvable:$true] %s20_s23  ;;  %s993_s26 = int_to_ptr.vmem [resolvable:$true] %s44_s26 }
  0x26   :  { %s814_s29 = scalar_lea.hbm %s1070_s0, 256 }
  0x27   :  { %p815_p2 = scmp.ne.s32.totalorder %s1070_s0, %s814_s29  ;;  %p818_p3 = scmp.lt.u32.totalorder %s814_s29, %s1070_s0 }
  0x29   :  { %p820_p4 = pnand %p818_p3, %p815_p2 }
  0x2b   :  { %823 = shalt.err (!%p820_p4)
}
  0x2c   :  { %s824_s3 = scalar_lea.vmem %s21_s23, 256  ;;  %p829_p6 = scmp.lt.s32.totalorder %s21_s23, %s21_s23 }
  0x2d   :  { %p825_p5 = scmp.ne.s32.totalorder %s21_s23, %s824_s3  ;;  %p830_p7 = scmp.lt.s32.totalorder %s824_s3, %s824_s3 }
  0x2f   :  { %p831_p8 = por %p830_p7, %p829_p6 }
  0x31   :  { %p832_p9 = pnand %p831_p8, %p825_p5 }
  0x33   :  { %835 = shalt.err (!%p832_p9)
}
  0x34   :  { %26 = dma.hbm_to_vmem [thread:$0]  %s1070_s0, 256, %s21_s23, [#allocation3], %s912_s9, %s912_s9, %s913_s10  }
  0x35   :  { %s836_s15 = scalar_lea.hbm %s1072_s2, 1280 }
  0x36   :  { %p837_p10 = scmp.ne.s32.totalorder %s1072_s2, %s836_s15  ;;  %p840_p11 = scmp.lt.u32.totalorder %s836_s15, %s1072_s2 }
  0x38   :  { %p842_p12 = pnand %p840_p11, %p837_p10 }
  0x3a   :  { %845 = shalt.err (!%p842_p12)
}
  0x3b   :  { %s846_s20 = scalar_lea.vmem %s993_s26, 1280  ;;  %p851_p0 = scmp.lt.s32.totalorder %s993_s26, %s993_s26 }
  0x3c   :  { %p847_p13 = scmp.ne.s32.totalorder %s993_s26, %s846_s20  ;;  %p852_p1 = scmp.lt.s32.totalorder %s846_s20, %s846_s20 }
  0x3e   :  { %p853_p2 = por %p852_p1, %p851_p0 }
  0x40   :  { %p854_p3 = pnand %p853_p2, %p847_p13 }
  0x42   :  { %857 = shalt.err (!%p854_p3)
}
  0x43   :  { %50 = dma.hbm_to_vmem [thread:$0]  %s1072_s2, 1280, %s993_s26, [#allocation6], %s912_s9, %s912_s9, %s913_s10  }
  0x44   :  { %s916_s21 = smov [#allocation10]   ;;  %s858_s27 = scalar_lea.hbm %s1074_s4, 2048 }
  0x45   :  { %s68_s22 = sshll.u32 %s916_s21, 4  ;;  %p859_p4 = scmp.ne.s32.totalorder %s1074_s4, %s858_s27  ;;  %s69_s22 = int_to_ptr.vmem [resolvable:$true] %s68_s22 }
  0x46   :  { %p862_p5 = scmp.lt.u32.totalorder %s858_s27, %s1074_s4 }
  0x48   :  { %p864_p6 = pnand %p862_p5, %p859_p4 }
  0x4a   :  { %867 = shalt.err (!%p864_p6)
}
  0x4b   :  { %s868_s8 = scalar_lea.vmem %s69_s22, 2048  ;;  %p873_p8 = scmp.lt.s32.totalorder %s69_s22, %s69_s22 }
  0x4c   :  { %p869_p7 = scmp.ne.s32.totalorder %s69_s22, %s868_s8  ;;  %p874_p9 = scmp.lt.s32.totalorder %s868_s8, %s868_s8 }
  0x4e   :  { %p875_p10 = por %p874_p9, %p873_p8 }
  0x50   :  { %p876_p11 = pnand %p875_p10, %p869_p7 }
  0x52   :  { %879 = shalt.err (!%p876_p11)
}
  0x53   :  { %74 = dma.hbm_to_vmem [thread:$0]  %s1074_s4, 2048, %s69_s22, [#allocation9], %s912_s9, %s912_s9, %s913_s10  }
  0x54   :  { %902 = dma.done.wait [#allocation3], 256  }
  0x55   :  { %903 = vsyncadd [#allocation3], 4294967040 }
  0x56   :  { %904 = dma.done.wait [#allocation6], 1536  }
  0x57   :  { %905 = vsyncadd [#allocation6], 4294965760 }
  0x58   :  { %906 = dma.done.wait [#allocation9], 3072  }
  0x59   :  { %907 = vsyncadd [#allocation9], 4294964224  ;;  %v97_v0 = vld [vmem:[#allocation7] sm:$0xff]  ;;  %v98_v1 = vld [vmem:[#allocation7 + $0x8] sm:$0xff]  ;;  %vm205_vm0 = vcmask 523264   ;;  %vm107_vm1 = vcmask 621568  }
  0x5a   :  { %v197_v2 = vld [vmem:[#allocation8] sm:$0xff]  ;;  %v657_v3 = vpack.c.bf16 %v98_v1, %v97_v0  ;;  %v198_v4 = vld [vmem:[#allocation8 + $0x8] sm:$0xff]  ;;  %v199_v9 = vld [vmem:[#allocation8 + $0x10] sm:$0xff]  ;;  %vm114_vm2 = vcmask 1043456   ;;  %vm917_vm3 = vmmov 1   ;;  %s918_s12 = smov [#allocation11]  }
  0x5b   :  { %v99_v5 = vld [vmem:[#allocation7 + $0x10] sm:$0xff]  ;;  %v100_v6 = vld [vmem:[#allocation7 + $0x18] sm:$0xff]  ;;  %v679_v7 = vpack.c.bf16 %v198_v4, %v197_v2  ;;  %v200_v10 = vld [vmem:[#allocation8 + $0x18] sm:$0xff]  ;;  %s468_s13 = sshll.u32 %s918_s12, 4  ;;  %s469_s13 = int_to_ptr.vmem [resolvable:$true] %s468_s13 }
  0x5c   :  { %v661_v8 = vpack.c.bf16 %v100_v6, %v99_v5  ;;  %v101_v11 = vld [vmem:[#allocation7 + $0x20] sm:$0xff]  ;;  %658 = vmatprep.subr.bf16.mxu0 %v657_v3  ;;  %v683_v12 = vpack.c.bf16 %v200_v10, %v199_v9  ;;  %v102_v13 = vld [vmem:[#allocation7 + $0x28] sm:$0xff]  ;;  %v201_v14 = vld [vmem:[#allocation8 + $0x20] sm:$0xff]  ;;  %p885_p13 = scmp.lt.s32.totalorder %s469_s13, %s469_s13 }
  0x5d   :  { %v202_v15 = vld [vmem:[#allocation8 + $0x28] sm:$0xff]  ;;  %660 = vmatpush3.bf16.msra.mxu0 %v657_v3  ;;  %680 = vmatprep.subr.bf16.mxu1 %v679_v7  ;;  %v665_v16 = vpack.c.bf16 %v102_v13, %v101_v11  ;;  %v103_v17 = vld [vmem:[#allocation7 + $0x30] sm:$0xff]  ;;  %v95_v21 = vld [vmem:[#allocation2] sm:$0xff] }
  0x5e   :  { %682 = vmatpush3.bf16.msra.mxu1 %v679_v7  ;;  %662 = vmatprep.subr.bf16.mxu0 %v661_v8  ;;  %v687_v18 = vpack.c.bf16 %v202_v15, %v201_v14  ;;  %v104_v19 = vld [vmem:[#allocation7 + $0x38] sm:$0xff]  ;;  %v195_v20 = vld [vmem:[#allocation5] sm:$0xff]  ;;  %v203_v22 = vld [vmem:[#allocation8 + $0x30] sm:$0xff] }
  0x5f   :  { %684 = vmatprep.subr.bf16.mxu1 %v683_v12  ;;  %v204_v23 = vld [vmem:[#allocation8 + $0x38] sm:$0xff]  ;;  %584 = vmatprep.mubr.msk.f32.mxu1 %vm205_vm0, %v195_v20  ;;  %v669_v24 = vpack.c.bf16 %v104_v19, %v103_v17  ;;  %v105_v26 = vld [vmem:[#allocation7 + $0x40] sm:$0xff]  ;;  %v289_v29 = vld [vmem:[#allocation10] sm:$0xff] }
  0x60   :  { %565 = vmatprep.mubr.msk.f32.mxu0 %vm107_vm1, %v95_v21  ;;  %v691_v25 = vpack.c.bf16 %v204_v23, %v203_v22  ;;  %v106_v27 = vld [vmem:[#allocation7 + $0x48] sm:$0xf]  ;;  %v290_v30 = vld [vmem:[#allocation10 + $0x8] sm:$0xff]  ;;  %vm674_vm4 = vmpackc.low %vm114_vm2, %vm917_vm3 }
  0x61   :  { %664 = vmatpush3.bf16.msra.mxu0 %v661_v8  ;;  %v673_v28 = vpack.c.bf16 %v106_v27, %v105_v26  ;;  %v695_v31 = vpack.c.bf16 %v290_v30, %v289_v29  ;;  %v196_v32 = vld [vmem:[#allocation5 + $0x8] sm:$0xff]  ;;  %v291_v33 = vld [vmem:[#allocation10 + $0x10] sm:$0xff]  ;;  %v292_v34 = vld [vmem:[#allocation10 + $0x18] sm:$0xff] }
  0x62   :  { %686 = vmatpush3.bf16.msra.mxu1 %v683_v12  ;;  %666 = vmatprep.subr.bf16.mxu0 %v665_v16  ;;  %v96_v35 = vld [vmem:[#allocation2 + $0x8] sm:$0xff]  ;;  %v699_v36 = vpack.c.bf16 %v292_v34, %v291_v33  ;;  %v293_v37 = vld [vmem:[#allocation10 + $0x20] sm:$0xff]  ;;  %v294_v38 = vld [vmem:[#allocation10 + $0x28] sm:$0xff] }
  0x63   :  { %688 = vmatprep.subr.bf16.mxu1 %v687_v18  ;;  %v703_v39 = vpack.c.bf16 %v294_v38, %v293_v37  ;;  %v295_v40 = vld [vmem:[#allocation10 + $0x30] sm:$0xff]  ;;  %v296_v41 = vld [vmem:[#allocation10 + $0x38] sm:$0xff]  ;;  %v297_v43 = vld [vmem:[#allocation10 + $0x40] sm:$0xff] }
  0x64   :  { %v707_v42 = vpack.c.bf16 %v296_v41, %v295_v40  ;;  %v298_v44 = vld [vmem:[#allocation10 + $0x48] sm:$0xff]  ;;  %v299_v46 = vld [vmem:[#allocation10 + $0x50] sm:$0xff]  ;;  %v300_v47 = vld [vmem:[#allocation10 + $0x58] sm:$0xff] }
  0x65   :  { %668 = vmatpush3.bf16.msra.mxu0 %v665_v16  ;;  %v711_v45 = vpack.c.bf16 %v298_v44, %v297_v43  ;;  %v715_v48 = vpack.c.bf16 %v300_v47, %v299_v46  ;;  %v301_v49 = vld [vmem:[#allocation10 + $0x60] sm:$0xff]  ;;  %v302_v50 = vld [vmem:[#allocation10 + $0x68] sm:$0xff]  ;;  %v303_v52 = vld [vmem:[#allocation10 + $0x70] sm:$0xff] }
  0x66   :  { %690 = vmatpush3.bf16.msra.mxu1 %v687_v18  ;;  %670 = vmatprep.subr.bf16.mxu0 %v669_v24  ;;  %v719_v51 = vpack.c.bf16 %v302_v50, %v301_v49  ;;  %v304_v53 = vld [vmem:[#allocation10 + $0x78] sm:$0xff]  ;;  %v93_v55 = vld [vmem:[%s1075_s5 + $0x1] ss:$0 sm:$0xff]  ;;  %v92_v59 = vld [vmem:[%s1075_s5] ss:$0 sm:$0xff] }
  0x67   :  { %692 = vmatprep.subr.bf16.mxu1 %v691_v25  ;;  %v723_v54 = vpack.c.bf16 %v304_v53, %v303_v52  ;;  %v94_v5 = vld [vmem:[%s1075_s5 + $0x2] ss:$0 sm:$0xff]  ;;  %s880_s5 = scalar_lea.vmem %s469_s13, 512 }
  0x68   :  { %p881_p12 = scmp.ne.s32.totalorder %s469_s13, %s880_s5  ;;  %p886_p0 = scmp.lt.s32.totalorder %s880_s5, %s880_s5 }
  0x69   :  { %672 = vmatpush3.bf16.msra.mxu0 %v669_v24 }
  0x6a   :  { %694 = vmatpush3.bf16.msra.mxu1 %v691_v25  ;;  %675 = vmatprep.subr.msk.bf16.mxu0 %vm674_vm4, %v673_v28  ;;  %p887_p1 = por %p886_p0, %p885_p13 }
  0x6b   :  { %696 = vmatprep.subr.bf16.mxu1 %v695_v31 }
  0x6c   :  { %p888_p2 = pnand %p887_p1, %p881_p12 }
  0x6d   :  { %678 = vmatpush3.bf16.msk.msra.mxu0 %vm674_vm4, %v673_v28  ;;  %585 = vmatmul.mubr.msk.f32.vlgmr.msra.gmra.mrb[0].mxu1 %vm205_vm0, %v196_v32 }
  0x6e   :  { %728 = vmatprep.subr.bf16.mxu0 %v695_v31  ;;  %698 = vmatpush3.bf16.msra.mxu1 %v695_v31 }
  0x6f   :  { %700 = vmatprep.subr.bf16.mxu1 %v699_v36 }
  0x70   :  { %566 = vmatmul.mubr.msk.f32.vlgmr.msra.gmra.mrb[0].mxu0 %vm107_vm1, %v96_v35 }
  0x71   :  { %730 = vmatpush3.bf16.msra.mxu0 %v695_v31 }
  0x72   :  { %732 = vmatprep.subr.bf16.mxu0 %v699_v36  ;;  %702 = vmatpush3.bf16.msra.mxu1 %v699_v36 }
  0x73   :  { %704 = vmatprep.subr.bf16.mxu1 %v703_v39 }
  0x75   :  { %734 = vmatpush3.bf16.msra.mxu0 %v699_v36 }
  0x76   :  { %736 = vmatprep.subr.bf16.mxu0 %v703_v39  ;;  %706 = vmatpush3.bf16.msra.mxu1 %v703_v39 }
  0x77   :  { %708 = vmatprep.subr.bf16.mxu1 %v707_v42 }
  0x79   :  { %738 = vmatpush3.bf16.msra.mxu0 %v703_v39 }
  0x7a   :  { %740 = vmatprep.subr.bf16.mxu0 %v707_v42  ;;  %710 = vmatpush3.bf16.msra.mxu1 %v707_v42 }
  0x7b   :  { %712 = vmatprep.subr.bf16.mxu1 %v711_v45 }
  0x7d   :  { %742 = vmatpush3.bf16.msra.mxu0 %v707_v42 }
  0x7e   :  { %744 = vmatprep.subr.bf16.mxu0 %v711_v45  ;;  %714 = vmatpush3.bf16.msra.mxu1 %v711_v45 }
  0x7f   :  { %716 = vmatprep.subr.bf16.mxu1 %v715_v48 }
  0x81   :  { %746 = vmatpush3.bf16.msra.mxu0 %v711_v45 }
  0x82   :  { %748 = vmatprep.subr.bf16.mxu0 %v715_v48  ;;  %718 = vmatpush3.bf16.msra.mxu1 %v715_v48 }
  0x83   :  { %720 = vmatprep.subr.bf16.mxu1 %v719_v51 }
  0x85   :  { %750 = vmatpush3.bf16.msra.mxu0 %v715_v48 }
  0x86   :  { %752 = vmatprep.subr.bf16.mxu0 %v719_v51  ;;  %722 = vmatpush3.bf16.msra.mxu1 %v719_v51 }
  0x87   :  { %724 = vmatprep.subr.bf16.mxu1 %v723_v54 }
  0x89   :  { %754 = vmatpush3.bf16.msra.mxu0 %v719_v51 }
  0x8a   :  { %756 = vmatprep.subr.bf16.mxu0 %v723_v54  ;;  %726 = vmatpush3.bf16.msra.mxu1 %v723_v54 }
  0x8d   :  { %758 = vmatpush3.bf16.msra.mxu0 %v723_v54 }
 0x140   :  { %v586_v56 = vpop.f32.mrb[0].mxu1 }
 0x141   :  { %v284_v57 = vadd.f32 %v586_v56, %v93_v55  ;;  %v278_v58 = vpop.f32.mrb[1].mxu1 }
 0x142   :  { %v279_v60 = vadd.f32 %v278_v58, %v93_v55 }
 0x143   :  { %v288_v61 = vmax.f32 %v284_v57, 0.0  ;;  %v567_v62 = vpop.f32.mrb[0].mxu0 }
 0x144   :  { %v287_v63 = vmax.f32 %v279_v60, 0.0  ;;  %v190_v0 = vadd.f32 %v567_v62, %v92_v59  ;;  %v184_v1 = vpop.f32.mrb[1].mxu0 }
 0x145   :  { %v185_v2 = vadd.f32 %v184_v1, %v92_v59 }
 0x146   :  { %654 = vmatprep.mubr.f32.mxu0 %v287_v63  ;;  %v194_v4 = vmax.f32 %v190_v0, 0.0 }
 0x147   :  { %v193_v3 = vmax.f32 %v185_v2, 0.0  ;;  %655 = vmatmul.mubr.f32.vlgmr.msra.gmra.mrb[2].mxu0 %v288_v61 }
 0x149   :  { %619 = vmatprep.mubr.f32.mxu1 %v193_v3 }
 0x14a   :  { %620 = vmatmul.mubr.f32.vlgmr.msra.gmra.mrb[2].mxu1 %v194_v4 }
 0x21a   :  { %v656_v6 = vpop.f32.mrb[2].mxu0 }
 0x21b   :  { %v452_v7 = vadd.f32 %v656_v6, %v94_v5  ;;  %v446_v8 = vpop.f32.mrb[3].mxu0 }
 0x21c   :  { %v447_v9 = vadd.f32 %v446_v8, %v94_v5 }
 0x21d   :  { %v460_v10 = vmax.f32 %v452_v7, 0.0  ;;  %v621_v11 = vpop.f32.mrb[2].mxu1 }
 0x21e   :  { %v459_v12 = vmax.f32 %v447_v9, 0.0  ;;  %v377_v13 = vadd.f32 %v621_v11, %v94_v5  ;;  %v371_v14 = vpop.f32.mrb[3].mxu1 }
 0x21f   :  { %462 = vst [vmem:[#allocation11 + $0x18] sm:$0xff] %v460_v10  ;;  %v372_v15 = vadd.f32 %v371_v14, %v94_v5 }
 0x220   :  { %461 = vst [vmem:[#allocation11 + $0x8] sm:$0xff] %v459_v12  ;;  %v456_v16 = vmax.f32 %v377_v13, 0.0 }
 0x221   :  { %v455_v17 = vmax.f32 %v372_v15, 0.0 }
 0x222   :  { %458 = vst [vmem:[#allocation11 + $0x10] sm:$0xff] %v456_v16 }
 0x223   :  { %457 = vst [vmem:[#allocation11] sm:$0xff] %v455_v17 }
 0x224   :  { %891 = shalt.err (!%p888_p2)
}
 0x225   :  { %s892_s16 = scalar_lea.hbm %s1076_s6, 512 }
 0x226   :  { %p893_p3 = scmp.ne.s32.totalorder %s1076_s6, %s892_s16  ;;  %p896_p4 = scmp.lt.u32.totalorder %s892_s16, %s1076_s6 }
 0x228   :  { %p898_p5 = pnand %p896_p4, %p893_p3 }
 0x22a   :  { %901 = shalt.err (!%p898_p5)
}
 0x22b   :  { %s919_s0 = smov 256   ;;  %s920_s1 = smov 16  }
 0x22c   :  { %474 = dma.vmem_to_hbm [thread:$0]  %s469_s13, 512, %s1076_s6, [#allocation4], %s919_s0, %s919_s0, %s920_s1  }
 0x22d   :  { %908 = dma.done.wait [#allocation4], 512  }
 0x22e   :  { %909 = vsyncadd [#allocation4], 4294966784 }
 0x22f   :  { %478 = vsyncpa [#allocation3], 1 }
 0x230   :  { %479 = vsyncpa [#allocation6], 1 }
 0x231   :  { %480 = vsyncpa [#allocation9], 1 }
 0x232   :  { %481 = vsyncpa [#allocation4], 1 }

</bundles_post_ra>
